<compile_context>
chip_gen: v6e
topology: v6e:2x2x1
jax: 0.10.0
libtpu: 0.0.40
codegen_flags: <defaults>
</compile_context>

<pallas_src>
import functools

import numpy as np
import jax
import jax.numpy as jnp
from jax.experimental import pallas as pl
from jax.experimental.pallas import tpu as pltpu

EPS = 1e-5  # PyTorch BatchNorm default eps


def _stable_sigmoid(z):
    # sigmoid(z) = 0.5*tanh(z/2) + 0.5  -> EUP tanh, no exp overflow.
    return 0.5 * jnp.tanh(0.5 * z) + 0.5


@functools.lru_cache(maxsize=None)
def _roll_shift_sign():
    """One-time probe of pltpu.roll's shift convention (guards against version drift)."""
    def probe_kernel(x_ref, o_ref):
        o_ref[...] = pltpu.roll(x_ref[...], 1, axis=1)

    x = jnp.tile(jnp.arange(128, dtype=jnp.float32)[None, :], (8, 1))
    out = np.asarray(pl.pallas_call(
        probe_kernel, out_shape=jax.ShapeDtypeStruct((8, 128), jnp.float32))(x))
    # np.roll convention: out[0, 1] == x[0, 0] == 0.
    return 1 if float(out[0, 1]) == 0.0 else -1


# -----------------------------------------------------------------------------
# Kernel 1: SpatialAttention, one image per grid step, HW on the lane axis.
#   In-kernel im2col via 9 lane-rolls + border masks, single [C,9C]x[9C,HW] matmul
#   (BN1 folded), ReLU, then 1x1 spatial sigmoid gate as an MXU matvec.
# -----------------------------------------------------------------------------
def spatial_attn_kernel(x_ref, mask_ref, w3_ref, b3_ref, wsp_ref, bsp_ref, y_ref,
                        *, height, width, roll_sign):
    hw = height * width
    x = x_ref[0].astype(jnp.float32)                                 # [C, HW]
    taps = []
    t = 0
    for oy in (-1, 0, 1):
        for ox in (-1, 0, 1):
            s = oy * width + ox                                      # flat spatial shift
            if s == 0:
                taps.append(x)                                       # center tap, no mask
            else:
                shift = (-s * roll_sign) % hw                        # rolled[i] = x[i + s]
                rolled = pltpu.roll(x, shift, axis=1)
                taps.append(rolled * mask_ref[t:t + 1, :])           # zero padded border
            t += 1
    xs = jnp.concatenate(taps, axis=0).astype(jnp.bfloat16)          # [9C, HW]
    conv = jnp.dot(w3_ref[...], xs, preferred_element_type=jnp.float32)  # [C, HW]
    out = jnp.maximum(conv + b3_ref[...], 0.0)                       # BN1 folded
    logit = (jnp.dot(wsp_ref[...], out, preferred_element_type=jnp.float32)
             + bsp_ref[...])                                         # [1, HW] MXU matvec
    gate = _stable_sigmoid(logit)
    y_ref[0] = (out * gate).astype(y_ref.dtype)


# -----------------------------------------------------------------------------
# Kernel 2: gated 1x1 reduce (+folded BN2) + ReLU + global average pool + MLP.
#   Channel gate is pre-folded into the per-sample reduce weight on the host.
# -----------------------------------------------------------------------------
def head_kernel(y_ref, wrg_ref, br_ref, wm1_ref, bm1_ref, wm2_ref, bm2_ref, o_ref,
                *, inv_hw):
    r = jnp.dot(wrg_ref[0], y_ref[0], preferred_element_type=jnp.float32)   # [hid, HW]
    r = jnp.maximum(r + br_ref[...], 0.0)
    pooled = jnp.sum(r, axis=1, keepdims=True) * inv_hw                     # [hid, 1]
    m1 = jnp.maximum(
        jnp.dot(wm1_ref[...], pooled, preferred_element_type=jnp.float32)
        + bm1_ref[...], 0.0)                                                # [rep, 1]
    o_ref[0] = (jnp.dot(wm2_ref[...], m1, preferred_element_type=jnp.float32)
                + bm2_ref[...]).astype(o_ref.dtype)


# -----------------------------------------------------------------------------
# Wrapper: host-side weight folding / layout plumbing + the two pallas_calls.
# -----------------------------------------------------------------------------
def material_head_forward(x_nchw, params):
    N, C, H, W = x_nchw.shape
    HW = H * W
    hidden = params["w_red"].shape[0]
    rep = params["w_m1"].shape[0]
    f32, bf16 = jnp.float32, jnp.bfloat16
    roll_sign = _roll_shift_sign()

    # ---- fold BN1 into the 3x3 conv; weight as [C_out, 9*C_in], tap-major ----
    s1 = params["bn1_g"] / jnp.sqrt(params["bn1_v"] + EPS)
    w3 = params["w_conv"] * s1[:, None, None, None]                  # [Co, Ci, 3, 3]
    w3cat = jnp.transpose(w3, (0, 2, 3, 1)).reshape(C, 9 * C).astype(bf16)
    b3col = ((params["b_conv"] - params["bn1_m"]) * s1
             + params["bn1_b"]).reshape(C, 1).astype(f32)
    wsp_row = params["w_spat"].reshape(1, C).astype(f32)
    bsp = params["b_spat"].reshape(1, 1).astype(f32)

    # ---- static border-validity masks for the 9 taps (9*HW f32 constant) ----
    hh, ww = np.meshgrid(np.arange(H), np.arange(W), indexing="ij")
    masks = []
    for oy in (-1, 0, 1):
        for ox in (-1, 0, 1):
            valid = ((hh + oy >= 0) & (hh + oy < H)
                     & (ww + ox >= 0) & (ww + ox < W))
            masks.append(valid.reshape(-1))
    border_mask = jnp.asarray(np.stack(masks).astype(np.float32))    # [9, HW]

    x_flat = x_nchw.reshape(N, C, HW).astype(bf16)                   # HW on lanes

    cost1 = pl.CostEstimate(
        flops=2 * N * HW * 9 * C * C + 2 * N * HW * C + 6 * N * HW * C,
        transcendentals=N * HW,
        bytes_accessed=2 * (x_flat.size + w3cat.size + N * C * HW) + 4 * 9 * HW,
    )
    y = pl.pallas_call(
        functools.partial(spatial_attn_kernel, height=H, width=W, roll_sign=roll_sign),
        out_shape=jax.ShapeDtypeStruct((N, C, HW), bf16),
        grid=(N,),
        in_specs=[
            pl.BlockSpec((1, C, HW), lambda n: (n, 0, 0)),
            pl.BlockSpec((9, HW), lambda n: (0, 0)),
            pl.BlockSpec((C, 9 * C), lambda n: (0, 0)),
            pl.BlockSpec((C, 1), lambda n: (0, 0)),
            pl.BlockSpec((1, C), lambda n: (0, 0)),
            pl.BlockSpec((1, 1), lambda n: (0, 0)),
        ],
        out_specs=pl.BlockSpec((1, C, HW), lambda n: (n, 0, 0)),
        compiler_params=pltpu.CompilerParams(
            dimension_semantics=("parallel",),
            vmem_limit_bytes=32 * 1024 * 1024),
        cost_estimate=cost1,
    )(x_flat, border_mask, w3cat, b3col, wsp_row, bsp)

    # ---- spectral descriptor + squeeze-excite channel gate (hoisted to host) ----
    # TODO(synk): FFT has no Pallas TPU primitive; rfft2 runs as an XLA op between kernels.
    y_img = y.reshape(N, C, H, W).astype(f32)
    freq = jnp.fft.rfft2(y_img, axes=(2, 3))
    desc = jnp.mean(jnp.abs(freq), axis=(2, 3))                      # [N, C]
    hgate = jnp.maximum(desc @ params["w_spec1"].T.astype(f32), 0.0)  # [N, C//red]
    gate = jax.nn.sigmoid(hgate @ params["w_spec2"].T.astype(f32))   # [N, C]

    # ---- fold BN2 + per-sample channel gate into the 1x1 reduce weight ----
    s2 = params["bn2_g"] / jnp.sqrt(params["bn2_v"] + EPS)
    wr_fold = params["w_red"] * s2[:, None]                          # [hidden, C]
    wrg = (wr_fold[None, :, :] * gate[:, None, :]).astype(bf16)      # [N, hidden, C]
    br_col = (params["bn2_b"] - s2 * params["bn2_m"]).reshape(hidden, 1).astype(f32)
    wm1 = params["w_m1"].astype(f32)                                 # [rep, hidden]
    bm1_col = params["b_m1"].reshape(rep, 1).astype(f32)
    wm2 = params["w_m2"].astype(f32)                                 # [rep, rep]
    bm2_col = params["b_m2"].reshape(rep, 1).astype(f32)

    cost2 = pl.CostEstimate(
        flops=2 * N * (hidden * C * HW + rep * hidden + rep * rep) + 2 * N * hidden * HW,
        transcendentals=0,
        bytes_accessed=2 * (y.size + wrg.size) + 4 * (wm1.size + wm2.size + N * rep),
    )
    out = pl.pallas_call(
        functools.partial(head_kernel, inv_hw=1.0 / HW),
        out_shape=jax.ShapeDtypeStruct((N, rep, 1), f32),
        grid=(N,),
        in_specs=[
            pl.BlockSpec((1, C, HW), lambda n: (n, 0, 0)),
            pl.BlockSpec((1, hidden, C), lambda n: (n, 0, 0)),
            pl.BlockSpec((hidden, 1), lambda n: (0, 0)),
            pl.BlockSpec((rep, hidden), lambda n: (0, 0)),
            pl.BlockSpec((rep, 1), lambda n: (0, 0)),
            pl.BlockSpec((rep, rep), lambda n: (0, 0)),
            pl.BlockSpec((rep, 1), lambda n: (0, 0)),
        ],
        out_specs=pl.BlockSpec((1, rep, 1), lambda n: (n, 0, 0)),
        compiler_params=pltpu.CompilerParams(
            dimension_semantics=("parallel",),
            vmem_limit_bytes=32 * 1024 * 1024),
        cost_estimate=cost2,
    )(y, wrg, br_col, wm1, bm1_col, wm2, bm2_col)

    return out.reshape(N, rep)


# -----------------------------------------------------------------------------
# Pure numpy reference (float64), mirroring the PyTorch module in eval mode.
# -----------------------------------------------------------------------------
def reference_forward(x_nchw, p):
    x = np.asarray(x_nchw, np.float64)
    N, C, H, W = x.shape
    wc = np.asarray(p["w_conv"], np.float64)
    bc = np.asarray(p["b_conv"], np.float64)
    g1, b1, m1, v1 = [np.asarray(p[k], np.float64)
                      for k in ("bn1_g", "bn1_b", "bn1_m", "bn1_v")]
    xp = np.pad(x, ((0, 0), (0, 0), (1, 1), (1, 1)))
    conv = np.zeros((N, C, H, W))
    for dy in range(3):
        for dx in range(3):
            conv += np.einsum("oc,nchw->nohw", wc[:, :, dy, dx],
                              xp[:, :, dy:dy + H, dx:dx + W])
    conv += bc[None, :, None, None]
    bn = ((conv - m1[None, :, None, None]) / np.sqrt(v1 + EPS)[None, :, None, None]
          * g1[None, :, None, None] + b1[None, :, None, None])
    out = np.maximum(bn, 0.0)
    wsp = np.asarray(p["w_spat"], np.float64).reshape(C)
    bsp = float(np.asarray(p["b_spat"]).reshape(()))
    gate = 1.0 / (1.0 + np.exp(-(np.einsum("c,nchw->nhw", wsp, out) + bsp)))
    y = out * gate[:, None, :, :]

    freq = np.fft.rfft2(y, axes=(-2, -1))
    desc = np.abs(freq).mean(axis=(-2, -1))                          # [N, C]
    w1 = np.asarray(p["w_spec1"], np.float64)
    w2 = np.asarray(p["w_spec2"], np.float64)
    hsp = np.maximum(desc @ w1.T, 0.0)
    wch = 1.0 / (1.0 + np.exp(-(hsp @ w2.T)))                        # [N, C]
    y2 = y * wch[:, :, None, None]

    wr = np.asarray(p["w_red"], np.float64)
    g2, b2, m2, v2 = [np.asarray(p[k], np.float64)
                      for k in ("bn2_g", "bn2_b", "bn2_m", "bn2_v")]
    r = np.einsum("kc,nchw->nkhw", wr, y2)
    r = ((r - m2[None, :, None, None]) / np.sqrt(v2 + EPS)[None, :, None, None]
         * g2[None, :, None, None] + b2[None, :, None, None])
    r = np.maximum(r, 0.0)
    pooled = r.mean(axis=(2, 3))                                     # [N, hidden]
    wm1 = np.asarray(p["w_m1"], np.float64); bm1 = np.asarray(p["b_m1"], np.float64)
    wm2 = np.asarray(p["w_m2"], np.float64); bm2 = np.asarray(p["b_m2"], np.float64)
    m = np.maximum(pooled @ wm1.T + bm1, 0.0)
    return m @ wm2.T + bm2


if __name__ == "__main__":
    N, C, H, W = 2, 32, 16, 16
    representation_size = 64
    hidden = representation_size // 2        # 32
    reduction = 16
    red_c = C // reduction                   # 2

    key = jax.random.PRNGKey(0)
    keys = jax.random.split(key, 20)
    x = jax.random.normal(keys[0], (N, C, H, W), jnp.float32)

    def nrm(k, shape, scale):
        return jax.random.normal(k, shape, jnp.float32) * scale

    params = {
        "w_conv": nrm(keys[1], (C, C, 3, 3), 1.0 / np.sqrt(9 * C)),
        "b_conv": nrm(keys[2], (C,), 0.1),
        "bn1_g": jax.random.uniform(keys[3], (C,), jnp.float32, 0.5, 1.5),
        "bn1_b": nrm(keys[4], (C,), 0.1),
        "bn1_m": nrm(keys[5], (C,), 0.1),
        "bn1_v": jax.random.uniform(keys[6], (C,), jnp.float32, 0.5, 1.5),
        "w_spat": nrm(keys[7], (1, C, 1, 1), 1.0 / np.sqrt(C)),
        "b_spat": nrm(keys[8], (1,), 0.1),
        "w_spec1": nrm(keys[9], (red_c, C), 1.0 / np.sqrt(C)),
        "w_spec2": nrm(keys[10], (C, red_c), 1.0 / np.sqrt(red_c)),
        "w_red": nrm(keys[11], (hidden, C), 1.0 / np.sqrt(C)),
        "bn2_g": jax.random.uniform(keys[12], (hidden,), jnp.float32, 0.5, 1.5),
        "bn2_b": nrm(keys[13], (hidden,), 0.1),
        "bn2_m": nrm(keys[14], (hidden,), 0.1),
        "bn2_v": jax.random.uniform(keys[15], (hidden,), jnp.float32, 0.5, 1.5),
        "w_m1": nrm(keys[16], (representation_size, hidden), 1.0 / np.sqrt(hidden)),
        "b_m1": nrm(keys[17], (representation_size,), 0.1),
        "w_m2": nrm(keys[18], (representation_size, representation_size),
                    1.0 / np.sqrt(representation_size)),
        "b_m2": nrm(keys[19], (representation_size,), 0.1),
    }

    out = material_head_forward(x, params)
    out = jax.block_until_ready(out)

    ref = reference_forward(x, params)
    # Tolerance sized for bf16 MXU operands (per performance review).
    np.testing.assert_allclose(np.asarray(out, np.float64), ref, rtol=2e-2, atol=2e-2)
    print("KERNEL_OK")
</pallas_src>

<mosaic_0001>
module attributes {stable_mosaic.version = 11 : i64} {
  func.func @probe_kernel(%arg0: memref<8x128xf32, #tpu.memory_space<vmem>>, %arg1: memref<8x128xf32, #tpu.memory_space<vmem>>) attributes {dimension_semantics = [], scalar_prefetch = 0 : i64, scratch_operands = 0 : i64, tpu.core_type = #tpu.core_type<tc>} {
    %c0 = arith.constant 0 : index
    %c0_0 = arith.constant 0 : index
    %0 = vector.load %arg0[%c0, %c0_0] : memref<8x128xf32, #tpu.memory_space<vmem>>, vector<8x128xf32>
    %c1_i32 = arith.constant 1 : i32
    %1 = tpu.dynamic_rotate %0 by %c1_i32 dim 1 : vector<8x128xf32>, i32 -> vector<8x128xf32>
    %c0_1 = arith.constant 0 : index
    %c0_2 = arith.constant 0 : index
    %2 = vector.load %arg1[%c0_1, %c0_2] : memref<8x128xf32, #tpu.memory_space<vmem>>, vector<8x128xf32>
    tpu.vector_store %arg1[%c0_1, %c0_2], %1 {strides = array<i32>} : memref<8x128xf32, #tpu.memory_space<vmem>>, vector<8x128xf32>,
    return
  }
}

</mosaic_0001>

<bundles_post_ra>
// kernel: tpu_custom_call.1
= control target key start
LH: loop header
LB: loop body
LE: loop exit
PB: predicated region body
PF: predicated region fallthrough
CT: control target
= control target key end

     0   :  { %6 = vsyncpa [#allocation3], 0  ;;  %s106_s0 = inlined_call_operand.hbm [shape: f32[8,128], index: 0, kind: input, shape index: {}]   ;;  %s107_s1 = inlined_call_operand.hbm [shape: f32[8,128], index: 1, kind: output, shape index: {}]  }
   0x1   :  { %7 = vsyncpa [#allocation4], 0  ;;  %s87_s6 = smov [#allocation2]  }
   0x2   :  { %s14_s7 = sshll.u32 %s87_s6, 4  ;;  %s15_s7 = int_to_ptr.vmem [resolvable:$true] %s14_s7 }
   0x3   :  { %s51_s8 = scalar_lea.vmem %s15_s7, 128  ;;  %p56_p1 = scmp.lt.s32.totalorder %s15_s7, %s15_s7 }
   0x4   :  { %p52_p0 = scmp.ne.s32.totalorder %s15_s7, %s51_s8  ;;  %p57_p2 = scmp.lt.s32.totalorder %s51_s8, %s51_s8 }
   0x6   :  { %p58_p3 = por %p57_p2, %p56_p1 }
   0x8   :  { %p59_p4 = pnand %p58_p3, %p52_p0 }
   0xa   :  { %62 = shalt.err (!%p59_p4)
}
   0xb   :  { %17 = dma.hbm_to_vmem [thread:$0]  %s106_s0, 128, %s15_s7, [#allocation3]  }
   0xc   :  { %83 = dma.done.wait [#allocation3], 128  }
   0xd   :  { %84 = vsyncadd [#allocation3], 4294967168  ;;  %v21_v0 = vld [vmem:[#allocation2] sm:$0xff]  ;;  %s88_s11 = smov 1   ;;  %s89_s12 = smov [#allocation5]  }
   0xe   :  { %22 = vrot.lane.b32.xlu0 %v21_v0, %s88_s11  ;;  %s31_s13 = sshll.u32 %s89_s12, 4  ;;  %s32_s13 = int_to_ptr.vmem [resolvable:$true] %s31_s13 }
   0xf   :  { %s63_s14 = scalar_lea.vmem %s32_s13, 128  ;;  %p68_p6 = scmp.lt.s32.totalorder %s32_s13, %s32_s13 }
  0x10   :  { %p64_p5 = scmp.ne.s32.totalorder %s32_s13, %s63_s14  ;;  %p69_p7 = scmp.lt.s32.totalorder %s63_s14, %s63_s14 }
  0x12   :  { %p70_p8 = por %p69_p7, %p68_p6 }
  0x14   :  { %p71_p9 = pnand %p70_p8, %p64_p5 }
  0x80   :  { %v23_v1 = vpop.permute.xlu0 %22 }
  0x81   :  { %24 = vst [vmem:[#allocation5] sm:$0xff] %v23_v1 }
  0x82   :  { %74 = shalt.err (!%p71_p9)
}
  0x83   :  { %34 = dma.vmem_to_hbm [thread:$0]  %s32_s13, 128, %s107_s1, [#allocation4]  }
  0x84   :  { %85 = dma.done.wait [#allocation4], 128  }
  0x85   :  { %86 = vsyncadd [#allocation4], 4294967168 }
  0x86   :  { %38 = vsyncpa [#allocation3], 1 }
  0x87   :  { %39 = vsyncpa [#allocation4], 1 }

</bundles_post_ra>
